<compile_context>
chip_gen: v5e
topology: v5e:2x2
jax: 0.10.0
libtpu: 0.0.40
codegen_flags: <defaults>
</compile_context>

<pallas_src>
import jax
import jax.numpy as jnp
from jax.experimental import pallas as pl
from jax.experimental.pallas import tpu as pltpu


def _gating_kernel(x_ref, w1_ref, b1_ref, w2_ref, b2_ref, o_ref):
    # First linear: bf16 operands on the MXU, f32 accumulation. Bias + ReLU in f32 (VPU).
    h = jnp.dot(x_ref[...], w1_ref[...], preferred_element_type=jnp.float32)
    h = jnp.maximum(h + b1_ref[...], 0.0)          # (TB, H) + (1, H) broadcast

    # Dropout(p=0.1): identity at inference.
    # TODO(synk): training-mode dropout mask via pltpu.prng_seed / pltpu.prng_random_bits.

    # Second linear: cast activations to bf16 for the MXU, accumulate in f32.
    logits = jnp.dot(h.astype(w2_ref.dtype), w2_ref[...],
                     preferred_element_type=jnp.float32)
    # Padded expert columns carry a -1e30 bias -> exp underflows to 0 -> softmax unaffected.
    logits = logits + b2_ref[...]                  # (TB, EP) + (1, EP) broadcast

    # Numerically stable softmax over the (padded) expert axis.
    m = jnp.max(logits, axis=-1, keepdims=True)
    e = jnp.exp(logits - m)
    denom = jnp.sum(e, axis=-1, keepdims=True)
    # Reciprocal on the EUP (its bundle slot is otherwise idle here).
    o_ref[...] = (e * pl.reciprocal(denom, approx=True)).astype(o_ref.dtype)


def moe_gating_forward(x, w1, b1, w2, b2, *, tb=512):
    """x: (B, input_size); w1: (input_size, H); b1: (H,);
       w2: (H, num_experts); b2: (num_experts,) -> (B, num_experts).

    tb: max batch-tile rows (multiple of 8). Kept modest so it also fits v7x's 64 MiB VMEM.
    """
    B, D = x.shape
    H = w1.shape[1]
    E = w2.shape[1]
    out_dtype = x.dtype

    # ---- one-time operand prep (outside the grid loop) -------------------------------
    # bf16 matmul operands (f32 accumulation happens inside the kernel).
    xb = x.astype(jnp.bfloat16)
    w1b = w1.astype(jnp.bfloat16)

    # Lane-dense output: pad expert dim to a multiple of 128.
    EP = max(128, ((E + 127) // 128) * 128)
    w2p = jnp.zeros((H, EP), jnp.bfloat16).at[:, :E].set(w2.astype(jnp.bfloat16))
    b2p = jnp.full((1, EP), -1e30, jnp.float32).at[0, :E].set(b2.astype(jnp.float32))
    b1_2d = b1.astype(jnp.float32).reshape(1, H)

    # ---- batch tiling ----------------------------------------------------------------
    TB = B if B <= tb else tb            # TB == B (full dim) or a multiple of 8
    grid = (pl.cdiv(B, TB),)

    # ---- cost hint for the XLA scheduler ----------------------------------------------
    out_bytes = B * EP * jnp.dtype(out_dtype).itemsize
    cost = pl.CostEstimate(
        flops=2 * B * (D * H + H * EP),
        transcendentals=B * (EP + 1),                      # exp + reciprocal
        bytes_accessed=(xb.size * 2 + w1b.size * 2 + w2p.size * 2
                        + b1_2d.size * 4 + b2p.size * 4 + out_bytes),
    )

    out_padded = pl.pallas_call(
        _gating_kernel,
        out_shape=jax.ShapeDtypeStruct((B, EP), out_dtype),
        grid=grid,
        in_specs=[
            pl.BlockSpec((TB, D), lambda i: (i, 0)),       # x tile (pipelined)
            pl.BlockSpec((D, H), lambda i: (0, 0)),        # W1 resident
            pl.BlockSpec((1, H), lambda i: (0, 0)),        # b1 resident
            pl.BlockSpec((H, EP), lambda i: (0, 0)),       # W2 (padded) resident
            pl.BlockSpec((1, EP), lambda i: (0, 0)),       # b2 (padded) resident
        ],
        out_specs=pl.BlockSpec((TB, EP), lambda i: (i, 0)),
        compiler_params=pltpu.CompilerParams(
            dimension_semantics=("parallel",),             # megacore-shard the batch axis
            vmem_limit_bytes=32 * 1024 * 1024,
        ),
        cost_estimate=cost,
    )(xb, w1b, b1_2d, w2p, b2p)

    # Slice the lane-padded expert dim back to E (padded columns are exactly 0).
    return out_padded[:, :E]


if __name__ == "__main__":
    # Small shapes consistent with the module's forward
    batch_size = 8
    input_size = 32
    hidden_size = 256   # module default
    num_experts = 4

    key = jax.random.PRNGKey(0)
    kx, kw1, kb1, kw2, kb2 = jax.random.split(key, 5)

    x = jax.random.normal(kx, (batch_size, input_size), dtype=jnp.float32)
    # Deterministic parameter init (synthetic; shapes follow nn.Linear)
    w1 = jax.random.normal(kw1, (input_size, hidden_size), dtype=jnp.float32) * 0.05
    b1 = jax.random.normal(kb1, (hidden_size,), dtype=jnp.float32) * 0.05
    w2 = jax.random.normal(kw2, (hidden_size, num_experts), dtype=jnp.float32) * 0.05
    b2 = jax.random.normal(kb2, (num_experts,), dtype=jnp.float32) * 0.05

    gate_weights = moe_gating_forward(x, w1, b1, w2, b2)
    jax.block_until_ready(gate_weights)

    # Pure-JAX reference with the same effective precision (bf16-rounded matmul operands).
    xb = x.astype(jnp.bfloat16).astype(jnp.float32)
    w1b = w1.astype(jnp.bfloat16).astype(jnp.float32)
    w2b = w2.astype(jnp.bfloat16).astype(jnp.float32)
    h_ref = jnp.maximum(xb @ w1b + b1, 0.0)
    h_refb = h_ref.astype(jnp.bfloat16).astype(jnp.float32)
    ref = jax.nn.softmax(h_refb @ w2b + b2, axis=-1)

    assert gate_weights.shape == (batch_size, num_experts)
    assert jnp.allclose(gate_weights, ref, atol=1e-2, rtol=1e-2)
    # approx reciprocal -> row sums deviate from 1.0 by ~1e-3; relaxed tolerance.
    assert jnp.allclose(jnp.sum(gate_weights, axis=-1), 1.0, atol=5e-3)

    print("KERNEL_OK")
</pallas_src>

<mosaic_0001>
module attributes {stable_mosaic.version = 11 : i64} {
  func.func @_gating_kernel(%arg0: i32, %arg1: memref<8x32xbf16, #tpu.memory_space<vmem>>, %arg2: memref<32x256xbf16, #tpu.memory_space<vmem>>, %arg3: memref<1x256xf32, #tpu.memory_space<vmem>>, %arg4: memref<256x128xbf16, #tpu.memory_space<vmem>>, %arg5: memref<1x128xf32, #tpu.memory_space<vmem>>, %arg6: memref<8x128xf32, #tpu.memory_space<vmem>>) attributes {dimension_semantics = [#tpu.dimension_semantics<parallel>], iteration_bounds = array<i64: 1>, scalar_prefetch = 0 : i64, scratch_operands = 0 : i64, tpu.core_type = #tpu.core_type<tc>, window_params = [{transform_indices = @transform_0, window_bounds = array<i64: 8, 32>}, {pipeline_mode = #tpu.pipeline_mode<synchronous>, transform_indices = @transform_1, window_bounds = array<i64: 32, 256>}, {pipeline_mode = #tpu.pipeline_mode<synchronous>, transform_indices = @transform_2, window_bounds = array<i64: 1, 256>}, {pipeline_mode = #tpu.pipeline_mode<synchronous>, transform_indices = @transform_3, window_bounds = array<i64: 256, 128>}, {pipeline_mode = #tpu.pipeline_mode<synchronous>, transform_indices = @transform_4, window_bounds = array<i64: 1, 128>}, {transform_indices = @transform_5, window_bounds = array<i64: 8, 128>}]} {
    %c0 = arith.constant 0 : index
    %c0_0 = arith.constant 0 : index
    %0 = vector.load %arg1[%c0, %c0_0] : memref<8x32xbf16, #tpu.memory_space<vmem>>, vector<8x32xbf16>
    %c0_1 = arith.constant 0 : index
    %c0_2 = arith.constant 0 : index
    %1 = vector.load %arg2[%c0_1, %c0_2] : memref<32x256xbf16, #tpu.memory_space<vmem>>, vector<32x256xbf16>
    %cst = arith.constant dense<0.000000e+00> : vector<8x256xf32>
    %2 = tpu.matmul %0, %1, %cst {dimension_numbers = #tpu.dot_dimension_numbers<[1], [0], [0], [1], [0, 0, 1, 1], [], []>} : vector<8x32xbf16>, vector<32x256xbf16>, vector<8x256xf32> -> vector<8x256xf32>
    %c0_3 = arith.constant 0 : index
    %c0_4 = arith.constant 0 : index
    %3 = vector.load %arg3[%c0_3, %c0_4] : memref<1x256xf32, #tpu.memory_space<vmem>>, vector<1x256xf32>
    %4 = vector.broadcast %3 : vector<1x256xf32> to vector<8x256xf32>
    %5 = arith.addf %2, %4 : vector<8x256xf32>
    %cst_5 = arith.constant 0.000000e+00 : f32
    %6 = vector.broadcast %cst_5 : f32 to vector<8x256xf32>
    %7 = arith.maximumf %5, %6 : vector<8x256xf32>
    %8 = arith.truncf %7 : vector<8x256xf32> to vector<8x256xbf16>
    %c0_6 = arith.constant 0 : index
    %c0_7 = arith.constant 0 : index
    %9 = vector.load %arg4[%c0_6, %c0_7] : memref<256x128xbf16, #tpu.memory_space<vmem>>, vector<256x128xbf16>
    %cst_8 = arith.constant dense<0.000000e+00> : vector<8x128xf32>
    %10 = tpu.matmul %8, %9, %cst_8 {dimension_numbers = #tpu.dot_dimension_numbers<[1], [0], [0], [1], [0, 0, 1, 1], [], []>} : vector<8x256xbf16>, vector<256x128xbf16>, vector<8x128xf32> -> vector<8x128xf32>
    %c0_9 = arith.constant 0 : index
    %c0_10 = arith.constant 0 : index
    %11 = vector.load %arg5[%c0_9, %c0_10] : memref<1x128xf32, #tpu.memory_space<vmem>>, vector<1x128xf32>
    %12 = vector.broadcast %11 : vector<1x128xf32> to vector<8x128xf32>
    %13 = arith.addf %10, %12 : vector<8x128xf32>
    %cst_11 = arith.constant dense<0xFF800000> : vector<8xf32>
    %14 = vector.multi_reduction <maximumf>, %13, %cst_11 [1] : vector<8x128xf32> to vector<8xf32>
    %15 = vector.shape_cast %14 : vector<8xf32> to vector<8x1xf32>
    %16 = vector.broadcast %15 : vector<8x1xf32> to vector<8x128xf32>
    %17 = arith.subf %13, %16 : vector<8x128xf32>
    %18 = math.exp %17 : vector<8x128xf32>
    %cst_12 = arith.constant dense<0.000000e+00> : vector<8xf32>
    %19 = vector.multi_reduction <add>, %18, %cst_12 [1] : vector<8x128xf32> to vector<8xf32>
    %20 = vector.shape_cast %19 : vector<8xf32> to vector<8x1xf32>
    %21 = tpu.reciprocal %20 {approx = true} : vector<8x1xf32> -> vector<8x1xf32>
    %22 = vector.broadcast %21 : vector<8x1xf32> to vector<8x128xf32>
    %23 = arith.mulf %18, %22 : vector<8x128xf32>
    %c0_13 = arith.constant 0 : index
    %c0_14 = arith.constant 0 : index
    %24 = vector.load %arg6[%c0_13, %c0_14] : memref<8x128xf32, #tpu.memory_space<vmem>>, vector<8x128xf32>
    tpu.vector_store %arg6[%c0_13, %c0_14], %23 {strides = array<i32>} : memref<8x128xf32, #tpu.memory_space<vmem>>, vector<8x128xf32>,
    return
  }
  func.func @transform_0(%arg0: i32) -> (i32, i32) {
    %c0_i32 = arith.constant 0 : i32
    %c0_i32_0 = arith.constant 0 : i32
    return %arg0, %c0_i32 : i32, i32
  }
  func.func @transform_1(%arg0: i32) -> (i32, i32) {
    %c0_i32 = arith.constant 0 : i32
    %c0_i32_0 = arith.constant 0 : i32
    %c0_i32_1 = arith.constant 0 : i32
    return %c0_i32, %c0_i32_0 : i32, i32
  }
  func.func @transform_2(%arg0: i32) -> (i32, i32) {
    %c0_i32 = arith.constant 0 : i32
    %c0_i32_0 = arith.constant 0 : i32
    %c0_i32_1 = arith.constant 0 : i32
    return %c0_i32, %c0_i32_0 : i32, i32
  }
  func.func @transform_3(%arg0: i32) -> (i32, i32) {
    %c0_i32 = arith.constant 0 : i32
    %c0_i32_0 = arith.constant 0 : i32
    %c0_i32_1 = arith.constant 0 : i32
    return %c0_i32, %c0_i32_0 : i32, i32
  }
  func.func @transform_4(%arg0: i32) -> (i32, i32) {
    %c0_i32 = arith.constant 0 : i32
    %c0_i32_0 = arith.constant 0 : i32
    %c0_i32_1 = arith.constant 0 : i32
    return %c0_i32, %c0_i32_0 : i32, i32
  }
  func.func @transform_5(%arg0: i32) -> (i32, i32) {
    %c0_i32 = arith.constant 0 : i32
    %c0_i32_0 = arith.constant 0 : i32
    return %arg0, %c0_i32 : i32, i32
  }
}

</mosaic_0001>

<bundles_post_ra>
// kernel: tpu_custom_call.1
= control target key start
LH: loop header
LB: loop body
LE: loop exit
PB: predicated region body
PF: predicated region fallthrough
CT: control target
= control target key end

     0   :  { %10 = vsyncpa [#allocation3], 0  ;;  %s634_s0 = inlined_call_operand.hbm [shape: bf16[8,32], index: 0, kind: input, shape index: {}]   ;;  %s635_s1 = inlined_call_operand.hbm [shape: bf16[32,256], index: 1, kind: input, shape index: {}]   ;;  %s636_s2 = inlined_call_operand.hbm [shape: f32[1,256], index: 2, kind: input, shape index: {}]   ;;  %s637_s3 = inlined_call_operand.hbm [shape: bf16[256,128], index: 3, kind: input, shape index: {}]   ;;  %s638_s4 = inlined_call_operand.vmem [shape: f32[1,128], index: 4, kind: input, shape index: {}]   ;;  %s639_s5 = inlined_call_operand.hbm [shape: f32[8,128], index: 5, kind: output, shape index: {}]  }
   0x1   :  { %11 = vsyncpa [#allocation6], 0 }
   0x2   :  { %12 = vsyncpa [#allocation9], 0  ;;  %s29_s20 = sshll.u32 %s635_s1, 4  ;;  %s30_s20 = int_to_ptr.hbm [resolvable:$true] %s29_s20 }
   0x3   :  { %13 = vsyncpa [#allocation4], 0  ;;  %s577_s21 = smov [#allocation5]   ;;  %s19_s25 = sshll.u32 %s634_s0, 4  ;;  %s20_s25 = int_to_ptr.hbm [resolvable:$true] %s19_s25 }
   0x4   :  { %s31_s22 = sshll.u32 %s577_s21, 4  ;;  %s578_s26 = smov 128   ;;  %s32_s22 = int_to_ptr.vmem [resolvable:$true] %s31_s22 }
   0x5   :  { %s579_s27 = smov 8   ;;  %s580_s28 = smov [#allocation2]  }
   0x6   :  { %37 = dma.hbm_to_vmem [thread:$0]  %s30_s20, 512, %s32_s22, [#allocation6], %s578_s26, %s578_s26, %s579_s27  }
   0x7   :  { %s21_s29 = sshll.u32 %s580_s28, 4  ;;  %s43_s7 = sshll.u32 %s636_s2, 4  ;;  %s22_s29 = int_to_ptr.vmem [resolvable:$true] %s21_s29  ;;  %s44_s7 = int_to_ptr.hbm [resolvable:$true] %s43_s7 }
   0x8   :  { %24 = dma.hbm_to_vmem [thread:$0]  %s20_s25, 64, %s22_s29, [#allocation3]  }
   0x9   :  { %s53_s9 = sshll.u32 %s637_s3, 4  ;;  %s581_s10 = smov [#allocation7]   ;;  %s54_s9 = int_to_ptr.hbm [resolvable:$true] %s53_s9 }
   0xa   :  { %s45_s11 = sshll.u32 %s581_s10, 4  ;;  %s582_s0 = smov [#allocation8]   ;;  %s46_s11 = int_to_ptr.vmem [resolvable:$true] %s45_s11 }
   0xb   :  { %48 = dma.hbm_to_vmem [thread:$0]  %s44_s7, 32, %s46_s11, [#allocation6]  }
   0xc   :  { %s55_s12 = sshll.u32 %s582_s0, 4  ;;  %s583_s13 = smov 64   ;;  %s56_s12 = int_to_ptr.vmem [resolvable:$true] %s55_s12 }
   0xd   :  { %s584_s14 = smov 4  }
   0xe   :  { %61 = dma.hbm_to_vmem [thread:$0]  %s54_s9, 2048, %s56_s12, [#allocation9], %s583_s13, %s583_s13, %s584_s14  }
   0xf   :  { %569 = dma.done.wait [#allocation3], 64  }
  0x10   :  { %570 = vsyncadd [#allocation3], 4294967232 }
  0x11   :  { %571 = dma.done.wait [#allocation6], 544  }
  0x12   :  { %572 = vsyncadd [#allocation6], 4294966752 }
  0x13   :  { %573 = dma.done.wait [#allocation9], 2048  }
  0x14   :  { %574 = vsyncadd [#allocation9], 4294965248  ;;  %v343_v0 = vld [vmem:[#allocation5 + $0x10] sm:$0xf]  ;;  %v418_v1 = vld [vmem:[#allocation5 + $0x14] sm:$0xf0] }
  0x15   :  { %v417_v2 = vld [vmem:[#allocation5 + $0x14] sm:$0xf]  ;;  %v344_v3 = vor.u32 %v418_v1, %v343_v0  ;;  %v345_v4 = vld [vmem:[#allocation5 + $0x18] sm:$0xf0]  ;;  %v335_v5 = vld [vmem:[#allocation5] sm:$0xf] }
  0x16   :  { %v416_v6 = vld [vmem:[#allocation5 + $0x4] sm:$0xf0]  ;;  %v348_v7 = vor.u32 %v417_v2, %v345_v4  ;;  %v415_v8 = vld [vmem:[#allocation5 + $0x4] sm:$0xf]  ;;  %v337_v9 = vld [vmem:[#allocation5 + $0x8] sm:$0xf0] }
  0x17   :  { %122 = vmatpush.bf16.msra.mxu0 %v344_v3  ;;  %v336_v10 = vor.u32 %v416_v6, %v335_v5  ;;  %v426_v11 = vld [vmem:[#allocation8 + $0x38] sm:$0xff]  ;;  %v340_v13 = vor.u32 %v415_v8, %v337_v9  ;;  %v425_v14 = vld [vmem:[#allocation8 + $0x30] sm:$0xff]  ;;  %vm112_vm0 = vcmask 261120   ;;  %v424_v17 = vld [vmem:[#allocation8 + $0x28] sm:$0xff]  ;;  %s585_s15 = smov [#allocation10]  }
  0x18   :  { %v434_v12 = vld [vmem:[#allocation8 + $0x78] sm:$0xff]  ;;  %135 = vmatpush.bf16.msra.mxu1 %v348_v7  ;;  %278 = vmatpush.bf16.msra.mxu2 %v426_v11  ;;  %v433_v15 = vld [vmem:[#allocation8 + $0x70] sm:$0xff]  ;;  %v432_v18 = vld [vmem:[#allocation8 + $0x68] sm:$0xff]  ;;  %s319_s16 = sshll.u32 %s585_s15, 4  ;;  %s320_s16 = int_to_ptr.vmem [resolvable:$true] %s319_s16 }
  0x19   :  { %291 = vmatpush.bf16.msra.mxu3 %v434_v12  ;;  %v81_v16 = vld [vmem:[#allocation2] sm:$0xf]  ;;  %v423_v19 = vld [vmem:[#allocation8 + $0x20] sm:$0xff]  ;;  %v421_v23 = vld [vmem:[#allocation8 + $0x10] sm:$0xff] }
  0x1a   :  { %v431_v20 = vld [vmem:[#allocation8 + $0x60] sm:$0xff]  ;;  %v422_v21 = vld [vmem:[#allocation8 + $0x18] sm:$0xff]  ;;  %v429_v24 = vld [vmem:[#allocation8 + $0x50] sm:$0xff] }
  0x1b   :  { %123 = vmatpush.bf16.msra.mxu0 %v336_v10  ;;  %v430_v22 = vld [vmem:[#allocation8 + $0x58] sm:$0xff]  ;;  %v420_v25 = vld [vmem:[#allocation8 + $0x8] sm:$0xff]  ;;  %v419_v27 = vld [vmem:[#allocation8] sm:$0xff] }
  0x1c   :  { %136 = vmatpush.bf16.msra.mxu1 %v340_v13  ;;  %279 = vmatpush.bf16.msra.mxu2 %v425_v14  ;;  %v428_v26 = vld [vmem:[#allocation8 + $0x48] sm:$0xff]  ;;  %v427_v28 = vld [vmem:[#allocation8 + $0x40] sm:$0xff]  ;;  %v86_v29 = vld [vmem:[#allocation7] sm:$0x3] }
  0x1d   :  { %292 = vmatpush.bf16.msra.mxu3 %v433_v15  ;;  %v88_v30 = vperm.slane %v86_v29, 0  ;;  %v89_v31 = vperm.slane %v86_v29, 1  ;;  %v444_v42 = vld [vmem:[%s638_s4] ss:$0 sm:$0xff]  ;;  %s321_s4 = sshll.u32 %s639_s5, 4  ;;  %s322_s4 = int_to_ptr.hbm [resolvable:$true] %s321_s4 }
  0x1e   :  { %349 = vmatmul.msk.bf16.vlgmr.msra.gmra.mxu0 %vm112_vm0, %v81_v16 }
  0x1f   :  { %350 = vmatmul.msk.bf16.vlgmr.msra.gmra.mxu1 %vm112_vm0, %v81_v16 }
  0x20   :  { %280 = vmatpush.bf16.msra.mxu2 %v424_v17 }
  0x21   :  { %293 = vmatpush.bf16.msra.mxu3 %v432_v18 }
  0x24   :  { %281 = vmatpush.bf16.msra.mxu2 %v423_v19 }
  0x25   :  { %294 = vmatpush.bf16.msra.mxu3 %v431_v20 }
  0x28   :  { %282 = vmatpush.bf16.msra.mxu2 %v422_v21 }
  0x29   :  { %295 = vmatpush.bf16.msra.mxu3 %v430_v22 }
  0x2c   :  { %283 = vmatpush.bf16.msra.mxu2 %v421_v23 }
  0x2d   :  { %296 = vmatpush.bf16.msra.mxu3 %v429_v24 }
  0x30   :  { %284 = vmatpush.bf16.msra.mxu2 %v420_v25 }
  0x31   :  { %297 = vmatpush.bf16.msra.mxu3 %v428_v26 }
  0x34   :  { %285 = vmatpush.bf16.msra.mxu2 %v419_v27 }
  0x35   :  { %298 = vmatpush.bf16.msra.mxu3 %v427_v28 }
  0x9b   :  { %v125_v32 = vpop.f32.mrf.mxu0 }
  0x9c   :  { %v126_v33 = vadd.f32 %v125_v32, %v88_v30  ;;  %v138_v34 = vpop.f32.mrf.mxu1 }
  0x9d   :  { %v139_v35 = vadd.f32 %v138_v34, %v89_v31 }
  0x9e   :  { %v142_v36 = vmax.f32 %v126_v33, 0.0 }
  0x9f   :  { %v143_v37 = vmax.f32 %v139_v35, 0.0 }
  0xa0   :  { %v144_v38 = vpack.c.bf16 %v142_v36, %v142_v36 }
  0xa1   :  { %v145_v39 = vpack.c.bf16 %v143_v37, %v143_v37 }
  0xa2   :  { %286 = vmatmul.bf16.vlgmr.msra.gmra.mxu2 %v144_v38 }
  0xa3   :  { %299 = vmatmul.bf16.vlgmr.msra.gmra.mxu3 %v145_v39  ;;  %v127_v40 = vpop.f32.mrf.mxu0 }
  0xa4   :  { %v140_v41 = vpop.f32.mrf.mxu1 }
 0x125   :  { %v287_v43 = vpop.f32.mrf.mxu2 }
 0x126   :  { %v288_v44 = vadd.f32 %v444_v42, %v287_v43  ;;  %v300_v45 = vpop.f32.mrf.mxu3 }
 0x128   :  { %v301_v46 = vadd.f32 %v300_v45, %v288_v44 }
 0x12a   :  { %304 = vmax.xlane.f32.xlu0 %v301_v46 }
 0x12d   :  { %v289_v47 = vpop.f32.mrf.mxu2 }
 0x12e   :  { %v302_v48 = vpop.f32.mrf.mxu3 }
 0x19d   :  { %v305_v49 = vpop.xlane.xlu0 %304 }
 0x19e   :  { %v306_v50 = vsub.f32 %v301_v46, %v305_v49 }
 0x1a0   :  { %v307_v51 = vmul.f32 1.442695, %v306_v50 }
 0x1a2   :  { %445 = vpow2.f32 %v307_v51 }
 0x1a8   :  { %v446_v52 = vpop.eup %445 }
 0x1a9   :  { %309 = vadd.xlane.f32.xlu0 %v446_v52 }
 0x21c   :  { %v310_v53 = vpop.xlane.xlu0 %309 }
 0x21d   :  { %447 = vrcp.f32 %v310_v53 }
 0x223   :  { %v448_v54 = vpop.eup %447 }
 0x224   :  { %v312_v55 = vmul.f32 %v448_v54, %v446_v52 }
 0x226   :  { %313 = vst [vmem:[#allocation10] sm:$0xff] %v312_v55 }
 0x227   :  { %324 = dma.vmem_to_hbm [thread:$0]  %s320_s16, 128, %s322_s4, [#allocation4]  }
 0x228   :  { %575 = dma.done.wait [#allocation4], 128  }
 0x229   :  { %576 = vsyncadd [#allocation4], 4294967168 }
 0x22a   :  { %329 = vsyncpa [#allocation3], 1 }
 0x22b   :  { %330 = vsyncpa [#allocation6], 1 }
 0x22c   :  { %331 = vsyncpa [#allocation9], 1 }
 0x22d   :  { %332 = vsyncpa [#allocation4], 1 }

</bundles_post_ra>
